<compile_context>
chip_gen: v5e
topology: v5e:2x2
jax: 0.10.0
libtpu: 0.0.40
codegen_flags: <defaults>
</compile_context>

<pallas_src>
import numpy as np
import jax
import jax.numpy as jnp
from jax.experimental import pallas as pl
from jax.experimental.pallas import tpu as pltpu

# ----------------------------- config (small, synthetic) ---------------------
BATCH = 2                # batch_size
SEQ = 8                  # input.shape[1]  (number of audio segments)
WAVE_LEN = 256           # per-segment waveform length
HIDDEN = 128             # backbone trunk width
NUM_CLASSES = (32, 16)   # backbone.num_classes  (two output heads)
N_HEADS = len(NUM_CLASSES)
C_PAD = 128              # lane-dense padded class dim (sum(NUM_CLASSES)=48 -> 128)


# ----------------------------- fused Pallas kernel ---------------------------
def _fused_sed_kernel(x_ref, w1_ref, b1_ref, w2_ref, b2_ref, wa_ref, ba_ref,
                      clip_ref, out_ref, att_ref):
    """Whole AudioClassifierSequenceSED forward in one kernel body.

    x_ref:  (B*T, L)   flattened segment waveforms
    w1/b1:  (L, H), (1, H)             trunk Linear
    w2/b2:  (H, C_PAD), (1, C_PAD)     per-head Linears concatenated + zero-padded
    wa/ba:  (C_PAD, C_PAD), (1, C_PAD) block-diagonal attention weights (+ pad)
    clip_ref: (B, T, C_PAD)  sigmoid clipwise (heads side by side on lanes)
    out_ref:  (B, C_PAD)     attention-pooled output
    att_ref:  (B, T, C_PAD)  attention_global
    """
    B, T, C = clip_ref.shape

    # Backbone stand-in: one lane-dense matmul for all B*T segments at once.
    x = x_ref[...]                                                    # (B*T, L)
    h = jnp.dot(x, w1_ref[...], preferred_element_type=jnp.float32) + b1_ref[...]
    h = jnp.maximum(h, 0.0)                                           # (B*T, H)

    clip = jax.nn.sigmoid(
        jnp.dot(h, w2_ref[...], preferred_element_type=jnp.float32) + b2_ref[...]
    )                                                                 # (B*T, C_PAD)

    # GlobalAttention (both heads at once via block-diagonal padded weights).
    logits = jnp.dot(clip, wa_ref[...], preferred_element_type=jnp.float32) + ba_ref[...]
    a = jnp.tanh(logits).reshape(B, T, C)                             # (B, T, C_PAD)
    clip3 = clip.reshape(B, T, C)

    # Softmax over T.  tanh already bounds logits to [-1, 1] -> exp cannot
    # overflow, so the max-subtraction is skipped; exact divide on a tiny
    # (B, 1, C_PAD) denominator keeps tight tolerances at zero cost.
    e = jnp.exp(a)
    att = e / jnp.sum(e, axis=1, keepdims=True)                       # (B, T, C_PAD)

    clip_ref[...] = clip3.astype(clip_ref.dtype)
    att_ref[...] = att.astype(att_ref.dtype)
    out_ref[...] = jnp.sum(att * clip3, axis=1).astype(out_ref.dtype)


# ----------------------------- weight packing (once, at init) ----------------
def pack_params(params):
    """Concatenate / zero-pad per-head parameters into lane-dense slabs.

    Done in numpy (no device dispatch) and uploaded once; the packed dict is
    what the jitted forward consumes on every call.
    """
    w2 = np.zeros((HIDDEN, C_PAD), np.float32)
    b2 = np.zeros((1, C_PAD), np.float32)
    wa = np.zeros((C_PAD, C_PAD), np.float32)   # block-diagonal
    ba = np.zeros((1, C_PAD), np.float32)
    off = 0
    for k, c in enumerate(NUM_CLASSES):
        w2[:, off:off + c] = np.asarray(params["backbone"]["w2"][k])
        b2[:, off:off + c] = np.asarray(params["backbone"]["b2"][k])
        wa[off:off + c, off:off + c] = np.asarray(params["attn_w"][k])
        ba[:, off:off + c] = np.asarray(params["attn_b"][k])
        off += c
    return {
        "w1": jnp.asarray(params["backbone"]["w1"]),
        "b1": jnp.asarray(params["backbone"]["b1"]),
        "w2": jnp.asarray(w2), "b2": jnp.asarray(b2),
        "wa": jnp.asarray(wa), "ba": jnp.asarray(ba),
    }


# ----------------------------- jitted forward --------------------------------
_VMEM_SPEC = pl.BlockSpec(memory_space=pltpu.MemorySpace.VMEM)


@jax.jit
def _forward_packed(x, packed):
    """x: (B, T, L), packed: slabs from pack_params.  Returns list of per-head
    dicts with 'clipwise' (B,T,C_k), 'output' (B,C_k), 'attention_global'
    (B,T,C_k) — mirrors AudioClassifierSequenceSED.forward."""
    B, T, L = x.shape
    x_flat = x.reshape(B * T, L)          # contiguous leading-dim merge: free

    clip_pad, out_pad, att_pad = pl.pallas_call(
        _fused_sed_kernel,
        out_shape=(
            jax.ShapeDtypeStruct((B, T, C_PAD), jnp.float32),
            jax.ShapeDtypeStruct((B, C_PAD), jnp.float32),
            jax.ShapeDtypeStruct((B, T, C_PAD), jnp.float32),
        ),
        # no grid: single step, full-extent VMEM-resident blocks (<0.3 MiB)
        in_specs=[_VMEM_SPEC] * 7,
        out_specs=(_VMEM_SPEC, _VMEM_SPEC, _VMEM_SPEC),
    )(x_flat, packed["w1"], packed["b1"], packed["w2"], packed["b2"],
      packed["wa"], packed["ba"])

    features = []
    off = 0
    for c in NUM_CLASSES:                 # static slices; fuse under jit
        features.append({
            "clipwise": clip_pad[:, :, off:off + c],
            "output": out_pad[:, off:off + c],
            "attention_global": att_pad[:, :, off:off + c],
        })
        off += c
    return features


def audio_classifier_sequence_sed_forward(x, packed_params, mixup_fn=None):
    """Public wrapper mirroring AudioClassifierSequenceSED.forward."""
    del mixup_fn  # None in this synthetic setting (no mixup); .to(device) no-op
    return _forward_packed(x, packed_params)


# ----------------------------- pure-JAX reference ----------------------------
def _reference_forward(x, params):
    h = jnp.maximum(jnp.einsum("btl,lh->bth", x, params["backbone"]["w1"])
                    + params["backbone"]["b1"], 0.0)
    feats = []
    for k in range(N_HEADS):
        clip = jax.nn.sigmoid(jnp.einsum("bth,hc->btc", h, params["backbone"]["w2"][k])
                              + params["backbone"]["b2"][k])
        a = jnp.tanh(jnp.einsum("btc,cd->btd", clip, params["attn_w"][k])
                     + params["attn_b"][k][None, :, :])
        att = jax.nn.softmax(a, axis=1)
        out = jnp.sum(att * clip, axis=1)
        feats.append({"clipwise": clip, "output": out, "attention_global": att})
    return feats


# ----------------------------- init & main ------------------------------------
def _init_params(key):
    ks = jax.random.split(key, 2 + 4 * N_HEADS)
    params = {
        "backbone": {
            "w1": 0.05 * jax.random.normal(ks[0], (WAVE_LEN, HIDDEN), jnp.float32),
            "b1": 0.01 * jax.random.normal(ks[1], (1, HIDDEN), jnp.float32),
            "w2": [],
            "b2": [],
        },
        "attn_w": [],
        "attn_b": [],
    }
    idx = 2
    for c in NUM_CLASSES:
        params["backbone"]["w2"].append(
            0.05 * jax.random.normal(ks[idx], (HIDDEN, c), jnp.float32)); idx += 1
        params["backbone"]["b2"].append(
            0.01 * jax.random.normal(ks[idx], (1, c), jnp.float32)); idx += 1
        params["attn_w"].append(
            0.1 * jax.random.normal(ks[idx], (c, c), jnp.float32)); idx += 1
        params["attn_b"].append(
            0.01 * jax.random.normal(ks[idx], (1, c), jnp.float32)); idx += 1
    return params


if __name__ == "__main__":
    key = jax.random.PRNGKey(0)
    k_x, k_p = jax.random.split(key)
    x = jax.random.normal(k_x, (BATCH, SEQ, WAVE_LEN), jnp.float32)
    params = _init_params(k_p)
    packed = pack_params(params)          # ONCE, outside the per-call path

    feats = audio_classifier_sequence_sed_forward(x, packed)
    feats = jax.block_until_ready(feats)
    # second call hits the jit cache (steady-state, dispatch-lean path)
    feats = jax.block_until_ready(audio_classifier_sequence_sed_forward(x, packed))

    ref = _reference_forward(x, params)
    # exact softmax divide -> tight tolerances everywhere; slight extra margin
    # on the post-attention quantities for transcendental/matmul-pass diffs.
    tol = {"clipwise": (1e-5, 1e-5),
           "output": (5e-5, 5e-5),
           "attention_global": (5e-5, 5e-5)}
    for k in range(N_HEADS):
        for name in ("clipwise", "output", "attention_global"):
            got, want = feats[k][name], ref[k][name]
            atol, rtol = tol[name]
            assert got.shape == want.shape, (name, got.shape, want.shape)
            assert jnp.allclose(got, want, atol=atol, rtol=rtol), name

    print("KERNEL_OK")
</pallas_src>

<mosaic_0001>
module attributes {stable_mosaic.version = 11 : i64} {
  func.func @_fused_sed_kernel(%arg0: memref<16x256xf32, #tpu.memory_space<vmem>>, %arg1: memref<256x128xf32, #tpu.memory_space<vmem>>, %arg2: memref<1x128xf32, #tpu.memory_space<vmem>>, %arg3: memref<128x128xf32, #tpu.memory_space<vmem>>, %arg4: memref<1x128xf32, #tpu.memory_space<vmem>>, %arg5: memref<128x128xf32, #tpu.memory_space<vmem>>, %arg6: memref<1x128xf32, #tpu.memory_space<vmem>>, %arg7: memref<2x8x128xf32, #tpu.memory_space<vmem>>, %arg8: memref<2x128xf32, #tpu.memory_space<vmem>>, %arg9: memref<2x8x128xf32, #tpu.memory_space<vmem>>) attributes {dimension_semantics = [], scalar_prefetch = 0 : i64, scratch_operands = 0 : i64, tpu.core_type = #tpu.core_type<tc>} {
    %c0 = arith.constant 0 : index
    %c0_0 = arith.constant 0 : index
    %0 = vector.load %arg0[%c0, %c0_0] : memref<16x256xf32, #tpu.memory_space<vmem>>, vector<16x256xf32>
    %c0_1 = arith.constant 0 : index
    %c0_2 = arith.constant 0 : index
    %1 = vector.load %arg1[%c0_1, %c0_2] : memref<256x128xf32, #tpu.memory_space<vmem>>, vector<256x128xf32>
    %cst = arith.constant dense<0.000000e+00> : vector<16x128xf32>
    %2 = tpu.matmul %0, %1, %cst {dimension_numbers = #tpu.dot_dimension_numbers<[1], [0], [0], [1], [0, 0, 1, 1], [], []>} : vector<16x256xf32>, vector<256x128xf32>, vector<16x128xf32> -> vector<16x128xf32>
    %c0_3 = arith.constant 0 : index
    %c0_4 = arith.constant 0 : index
    %3 = vector.load %arg2[%c0_3, %c0_4] : memref<1x128xf32, #tpu.memory_space<vmem>>, vector<1x128xf32>
    %4 = vector.broadcast %3 : vector<1x128xf32> to vector<16x128xf32>
    %5 = arith.addf %2, %4 : vector<16x128xf32>
    %cst_5 = arith.constant 0.000000e+00 : f32
    %6 = vector.broadcast %cst_5 : f32 to vector<16x128xf32>
    %7 = arith.maximumf %5, %6 : vector<16x128xf32>
    %c0_6 = arith.constant 0 : index
    %c0_7 = arith.constant 0 : index
    %8 = vector.load %arg3[%c0_6, %c0_7] : memref<128x128xf32, #tpu.memory_space<vmem>>, vector<128x128xf32>
    %cst_8 = arith.constant dense<0.000000e+00> : vector<16x128xf32>
    %9 = tpu.matmul %7, %8, %cst_8 {dimension_numbers = #tpu.dot_dimension_numbers<[1], [0], [0], [1], [0, 0, 1, 1], [], []>} : vector<16x128xf32>, vector<128x128xf32>, vector<16x128xf32> -> vector<16x128xf32>
    %c0_9 = arith.constant 0 : index
    %c0_10 = arith.constant 0 : index
    %10 = vector.load %arg4[%c0_9, %c0_10] : memref<1x128xf32, #tpu.memory_space<vmem>>, vector<1x128xf32>
    %11 = vector.broadcast %10 : vector<1x128xf32> to vector<16x128xf32>
    %12 = arith.addf %9, %11 : vector<16x128xf32>
    %13 = arith.negf %12 : vector<16x128xf32>
    %14 = math.exp %13 : vector<16x128xf32>
    %cst_11 = arith.constant 1.000000e+00 : f32
    %15 = vector.broadcast %cst_11 : f32 to vector<16x128xf32>
    %16 = arith.addf %15, %14 : vector<16x128xf32>
    %17 = arith.divf %15, %16 : vector<16x128xf32>
    %c0_12 = arith.constant 0 : index
    %c0_13 = arith.constant 0 : index
    %18 = vector.load %arg5[%c0_12, %c0_13] : memref<128x128xf32, #tpu.memory_space<vmem>>, vector<128x128xf32>
    %cst_14 = arith.constant dense<0.000000e+00> : vector<16x128xf32>
    %19 = tpu.matmul %17, %18, %cst_14 {dimension_numbers = #tpu.dot_dimension_numbers<[1], [0], [0], [1], [0, 0, 1, 1], [], []>} : vector<16x128xf32>, vector<128x128xf32>, vector<16x128xf32> -> vector<16x128xf32>
    %c0_15 = arith.constant 0 : index
    %c0_16 = arith.constant 0 : index
    %20 = vector.load %arg6[%c0_15, %c0_16] : memref<1x128xf32, #tpu.memory_space<vmem>>, vector<1x128xf32>
    %21 = vector.broadcast %20 : vector<1x128xf32> to vector<16x128xf32>
    %22 = arith.addf %19, %21 : vector<16x128xf32>
    %23 = math.tanh %22 : vector<16x128xf32>
    %24 = vector.shape_cast %23 : vector<16x128xf32> to vector<2x8x128xf32>
    %25 = vector.shape_cast %17 : vector<16x128xf32> to vector<2x8x128xf32>
    %26 = math.exp %24 : vector<2x8x128xf32>
    %cst_17 = arith.constant dense<0.000000e+00> : vector<2x128xf32>
    %27 = vector.multi_reduction <add>, %26, %cst_17 [1] : vector<2x8x128xf32> to vector<2x128xf32>
    %28 = vector.shape_cast %27 : vector<2x128xf32> to vector<2x1x128xf32>
    %29 = vector.broadcast %28 : vector<2x1x128xf32> to vector<2x8x128xf32>
    %30 = arith.divf %26, %29 : vector<2x8x128xf32>
    %c0_18 = arith.constant 0 : index
    %c0_19 = arith.constant 0 : index
    %c0_20 = arith.constant 0 : index
    %31 = vector.load %arg7[%c0_18, %c0_19, %c0_20] : memref<2x8x128xf32, #tpu.memory_space<vmem>>, vector<2x8x128xf32>
    tpu.vector_store %arg7[%c0_18, %c0_19, %c0_20], %25 {strides = array<i32>} : memref<2x8x128xf32, #tpu.memory_space<vmem>>, vector<2x8x128xf32>,
    %c0_21 = arith.constant 0 : index
    %c0_22 = arith.constant 0 : index
    %c0_23 = arith.constant 0 : index
    %32 = vector.load %arg9[%c0_21, %c0_22, %c0_23] : memref<2x8x128xf32, #tpu.memory_space<vmem>>, vector<2x8x128xf32>
    tpu.vector_store %arg9[%c0_21, %c0_22, %c0_23], %30 {strides = array<i32>} : memref<2x8x128xf32, #tpu.memory_space<vmem>>, vector<2x8x128xf32>,
    %33 = arith.mulf %30, %25 : vector<2x8x128xf32>
    %cst_24 = arith.constant dense<0.000000e+00> : vector<2x128xf32>
    %34 = vector.multi_reduction <add>, %33, %cst_24 [1] : vector<2x8x128xf32> to vector<2x128xf32>
    %c0_25 = arith.constant 0 : index
    %c0_26 = arith.constant 0 : index
    %35 = vector.load %arg8[%c0_25, %c0_26] : memref<2x128xf32, #tpu.memory_space<vmem>>, vector<2x128xf32>
    tpu.vector_store %arg8[%c0_25, %c0_26], %34 {strides = array<i32>} : memref<2x128xf32, #tpu.memory_space<vmem>>, vector<2x128xf32>,
    return
  }
}

</mosaic_0001>

<bundles_post_ra>
// kernel: _forward_packed.1
= control target key start
LH: loop header
LB: loop body
LE: loop exit
PB: predicated region body
PF: predicated region fallthrough
CT: control target
= control target key end

     0   :  { %15 = vsyncpa [#allocation3], 0  ;;  %s630_s0 = inlined_call_operand.hbm [shape: f32[16,256], index: 0, kind: input, shape index: {}]   ;;  %s631_s1 = inlined_call_operand.hbm [shape: f32[256,128], index: 1, kind: input, shape index: {}]   ;;  %s632_s2 = inlined_call_operand.vmem [shape: f32[1,128], index: 2, kind: input, shape index: {}]   ;;  %s633_s3 = inlined_call_operand.hbm [shape: f32[128,128], index: 3, kind: input, shape index: {}]   ;;  %s634_s4 = inlined_call_operand.vmem [shape: f32[1,128], index: 4, kind: input, shape index: {}]   ;;  %s635_s5 = inlined_call_operand.hbm [shape: f32[128,128], index: 5, kind: input, shape index: {}]   ;;  %s636_s6 = inlined_call_operand.vmem [shape: f32[1,128], index: 6, kind: input, shape index: {}]   ;;  %s637_s7 = inlined_call_operand.vmem [shape: f32[2,8,128], index: 7, kind: output, shape index: {0}]   ;;  %s638_s8 = inlined_call_operand.vmem [shape: f32[2,128], index: 8, kind: output, shape index: {1}]   ;;  %s639_s9 = inlined_call_operand.vmem [shape: f32[2,8,128], index: 9, kind: output, shape index: {2}]  }
   0x1   :  { %16 = vsyncpa [#allocation5], 0  ;;  %s35_s11 = sshll.u32 %s631_s1, 4  ;;  %s36_s11 = int_to_ptr.hbm [resolvable:$true] %s35_s11 }
   0x2   :  { %17 = vsyncpa [#allocation8], 0  ;;  %s526_s12 = smov [#allocation4]   ;;  %s22_s16 = sshll.u32 %s630_s0, 4  ;;  %s23_s16 = int_to_ptr.hbm [resolvable:$true] %s22_s16 }
   0x3   :  { %s37_s13 = sshll.u32 %s526_s12, 4  ;;  %s527_s17 = smov 128   ;;  %s38_s13 = int_to_ptr.vmem [resolvable:$true] %s37_s13 }
   0x4   :  { %s528_s18 = smov 8   ;;  %s529_s19 = smov [#allocation2]  }
   0x5   :  { %43 = dma.hbm_to_vmem [thread:$0]  %s36_s11, 4096, %s38_s13, [#allocation5], %s527_s17, %s527_s17, %s528_s18  }
   0x6   :  { %s24_s20 = sshll.u32 %s529_s19, 4  ;;  %s530_s21 = smov 256   ;;  %s25_s20 = int_to_ptr.vmem [resolvable:$true] %s24_s20 }
   0x7   :  { %s531_s22 = smov 16   ;;  %s50_s24 = sshll.u32 %s633_s3, 4  ;;  %s51_s24 = int_to_ptr.hbm [resolvable:$true] %s50_s24 }
   0x8   :  { %30 = dma.hbm_to_vmem [thread:$0]  %s23_s16, 512, %s25_s20, [#allocation3], %s530_s21, %s530_s21, %s531_s22  }
   0x9   :  { %s532_s25 = smov [#allocation6]   ;;  %s65_s28 = sshll.u32 %s635_s5, 4  ;;  %s66_s28 = int_to_ptr.hbm [resolvable:$true] %s65_s28 }
   0xa   :  { %s52_s26 = sshll.u32 %s532_s25, 4  ;;  %s533_s29 = smov [#allocation7]   ;;  %s53_s26 = int_to_ptr.vmem [resolvable:$true] %s52_s26 }
   0xb   :  { %58 = dma.hbm_to_vmem [thread:$0]  %s51_s24, 2048, %s53_s26, [#allocation5], %s527_s17, %s527_s17, %s528_s18  }
   0xc   :  { %s67_s30 = sshll.u32 %s533_s29, 4  ;;  %s68_s30 = int_to_ptr.vmem [resolvable:$true] %s67_s30 }
   0xd   :  { %73 = dma.hbm_to_vmem [thread:$0]  %s66_s28, 2048, %s68_s30, [#allocation8], %s527_s17, %s527_s17, %s528_s18  }
   0xe   :  { %520 = dma.done.wait [#allocation3], 512  }
   0xf   :  { %521 = vsyncadd [#allocation3], 4294966784 }
  0x10   :  { %522 = dma.done.wait [#allocation5], 6144  }
  0x11   :  { %523 = vsyncadd [#allocation5], 4294961152 }
  0x12   :  { %524 = dma.done.wait [#allocation8], 2048  }
  0x13   :  { %525 = vsyncadd [#allocation8], 4294965248  ;;  %v111_v0 = vld [vmem:[#allocation4 + $0x78] sm:$0xff]  ;;  %v110_v1 = vld [vmem:[#allocation4 + $0x70] sm:$0xff] }
  0x14   :  { %v127_v2 = vld [vmem:[#allocation4 + $0xf8] sm:$0xff]  ;;  %132 = vmatpush.msra.mxu0 %v111_v0  ;;  %v126_v3 = vld [vmem:[#allocation4 + $0xf0] sm:$0xff]  ;;  %v109_v4 = vld [vmem:[#allocation4 + $0x68] sm:$0xff] }
  0x15   :  { %155 = vmatpush.msra.mxu1 %v127_v2  ;;  %v125_v5 = vld [vmem:[#allocation4 + $0xe8] sm:$0xff]  ;;  %v108_v6 = vld [vmem:[#allocation4 + $0x60] sm:$0xff]  ;;  %v107_v8 = vld [vmem:[#allocation4 + $0x58] sm:$0xff] }
  0x16   :  { %133 = vmatpush.msra.mxu0 %v110_v1  ;;  %v124_v7 = vld [vmem:[#allocation4 + $0xe0] sm:$0xff]  ;;  %v123_v9 = vld [vmem:[#allocation4 + $0xd8] sm:$0xff]  ;;  %v106_v10 = vld [vmem:[#allocation4 + $0x50] sm:$0xff] }
  0x17   :  { %156 = vmatpush.msra.mxu1 %v126_v3  ;;  %v122_v11 = vld [vmem:[#allocation4 + $0xd0] sm:$0xff]  ;;  %v105_v12 = vld [vmem:[#allocation4 + $0x48] sm:$0xff]  ;;  %v104_v14 = vld [vmem:[#allocation4 + $0x40] sm:$0xff] }
  0x18   :  { %134 = vmatpush.msra.mxu0 %v109_v4  ;;  %v121_v13 = vld [vmem:[#allocation4 + $0xc8] sm:$0xff]  ;;  %v120_v15 = vld [vmem:[#allocation4 + $0xc0] sm:$0xff]  ;;  %v195_v16 = vld [vmem:[#allocation6 + $0x78] sm:$0xff] }
  0x19   :  { %157 = vmatpush.msra.mxu1 %v125_v5  ;;  %v194_v17 = vld [vmem:[#allocation6 + $0x70] sm:$0xff]  ;;  %v103_v18 = vld [vmem:[#allocation4 + $0x38] sm:$0xff]  ;;  %200 = vmatpush.msra.mxu2 %v195_v16  ;;  %v193_v21 = vld [vmem:[#allocation6 + $0x68] sm:$0xff] }
  0x1a   :  { %135 = vmatpush.msra.mxu0 %v108_v6  ;;  %v119_v19 = vld [vmem:[#allocation4 + $0xb8] sm:$0xff]  ;;  %v102_v20 = vld [vmem:[#allocation4 + $0x30] sm:$0xff]  ;;  %v192_v23 = vld [vmem:[#allocation6 + $0x60] sm:$0xff] }
  0x1b   :  { %158 = vmatpush.msra.mxu1 %v124_v7  ;;  %v118_v22 = vld [vmem:[#allocation4 + $0xb0] sm:$0xff]  ;;  %201 = vmatpush.msra.mxu2 %v194_v17  ;;  %v101_v24 = vld [vmem:[#allocation4 + $0x28] sm:$0xff]  ;;  %v191_v26 = vld [vmem:[#allocation6 + $0x58] sm:$0xff] }
  0x1c   :  { %136 = vmatpush.msra.mxu0 %v107_v8  ;;  %v117_v25 = vld [vmem:[#allocation4 + $0xa8] sm:$0xff]  ;;  %v100_v27 = vld [vmem:[#allocation4 + $0x20] sm:$0xff]  ;;  %v190_v29 = vld [vmem:[#allocation6 + $0x50] sm:$0xff] }
  0x1d   :  { %159 = vmatpush.msra.mxu1 %v123_v9  ;;  %202 = vmatpush.msra.mxu2 %v193_v21  ;;  %v116_v28 = vld [vmem:[#allocation4 + $0xa0] sm:$0xff]  ;;  %v99_v30 = vld [vmem:[#allocation4 + $0x18] sm:$0xff]  ;;  %v189_v32 = vld [vmem:[#allocation6 + $0x48] sm:$0xff] }
  0x1e   :  { %137 = vmatpush.msra.mxu0 %v106_v10  ;;  %v115_v31 = vld [vmem:[#allocation4 + $0x98] sm:$0xff]  ;;  %v98_v33 = vld [vmem:[#allocation4 + $0x10] sm:$0xff]  ;;  %v188_v35 = vld [vmem:[#allocation6 + $0x40] sm:$0xff] }
  0x1f   :  { %160 = vmatpush.msra.mxu1 %v122_v11  ;;  %203 = vmatpush.msra.mxu2 %v192_v23  ;;  %v114_v34 = vld [vmem:[#allocation4 + $0x90] sm:$0xff]  ;;  %v97_v36 = vld [vmem:[#allocation4 + $0x8] sm:$0xff]  ;;  %v187_v38 = vld [vmem:[#allocation6 + $0x38] sm:$0xff] }
  0x20   :  { %138 = vmatpush.msra.mxu0 %v105_v12  ;;  %v113_v37 = vld [vmem:[#allocation4 + $0x88] sm:$0xff]  ;;  %v96_v39 = vld [vmem:[#allocation4] sm:$0xff]  ;;  %v186_v43 = vld [vmem:[#allocation6 + $0x30] sm:$0xff] }
  0x21   :  { %161 = vmatpush.msra.mxu1 %v121_v13  ;;  %204 = vmatpush.msra.mxu2 %v191_v26  ;;  %v112_v40 = vld [vmem:[#allocation4 + $0x80] sm:$0xff]  ;;  %v93_v42 = vld [vmem:[#allocation2 + $0x8] sm:$0xff]  ;;  %v94_v46 = vld [vmem:[#allocation2 + $0x10] sm:$0xff] }
  0x22   :  { %139 = vmatpush.msra.mxu0 %v104_v14  ;;  %v92_v41 = vld [vmem:[#allocation2] sm:$0xff]  ;;  %v185_v44 = vld [vmem:[#allocation6 + $0x28] sm:$0xff]  ;;  %v95_v47 = vld [vmem:[#allocation2 + $0x18] sm:$0xff] }
  0x23   :  { %162 = vmatpush.msra.mxu1 %v120_v15  ;;  %205 = vmatpush.msra.mxu2 %v190_v29  ;;  %v184_v45 = vld [vmem:[#allocation6 + $0x20] sm:$0xff]  ;;  %v183_v48 = vld [vmem:[#allocation6 + $0x18] sm:$0xff]  ;;  %v182_v49 = vld [vmem:[#allocation6 + $0x10] sm:$0xff] }
  0x24   :  { %140 = vmatpush.msra.mxu0 %v103_v18  ;;  %v181_v50 = vld [vmem:[#allocation6 + $0x8] sm:$0xff]  ;;  %v180_v51 = vld [vmem:[#allocation6] sm:$0xff]  ;;  %v276_v63 = vld [vmem:[#allocation7 + $0x78] sm:$0xff] }
  0x25   :  { %163 = vmatpush.msra.mxu1 %v119_v19  ;;  %206 = vmatpush.msra.mxu2 %v189_v32  ;;  %v401_v52 = vld [vmem:[%s632_s2] ss:$0 sm:$0xff]  ;;  %v275_v0 = vld [vmem:[#allocation7 + $0x70] sm:$0xff]  ;;  %v274_v1 = vld [vmem:[#allocation7 + $0x68] sm:$0xff] }
  0x26   :  { %141 = vmatpush.msra.mxu0 %v102_v20  ;;  %281 = vmatpush.msra.mxu3 %v276_v63  ;;  %v273_v2 = vld [vmem:[#allocation7 + $0x60] sm:$0xff]  ;;  %v272_v3 = vld [vmem:[#allocation7 + $0x58] sm:$0xff]  ;;  %v271_v4 = vld [vmem:[#allocation7 + $0x50] sm:$0xff] }
  0x27   :  { %164 = vmatpush.msra.mxu1 %v118_v22  ;;  %207 = vmatpush.msra.mxu2 %v188_v35  ;;  %v270_v5 = vld [vmem:[#allocation7 + $0x48] sm:$0xff]  ;;  %v269_v6 = vld [vmem:[#allocation7 + $0x40] sm:$0xff]  ;;  %v268_v7 = vld [vmem:[#allocation7 + $0x38] sm:$0xff] }
  0x28   :  { %142 = vmatpush.msra.mxu0 %v101_v24  ;;  %282 = vmatpush.msra.mxu3 %v275_v0  ;;  %v267_v8 = vld [vmem:[#allocation7 + $0x30] sm:$0xff]  ;;  %v266_v9 = vld [vmem:[#allocation7 + $0x28] sm:$0xff]  ;;  %v265_v10 = vld [vmem:[#allocation7 + $0x20] sm:$0xff] }
  0x29   :  { %165 = vmatpush.msra.mxu1 %v117_v25  ;;  %208 = vmatpush.msra.mxu2 %v187_v38  ;;  %v264_v11 = vld [vmem:[#allocation7 + $0x18] sm:$0xff]  ;;  %v263_v12 = vld [vmem:[#allocation7 + $0x10] sm:$0xff]  ;;  %v262_v13 = vld [vmem:[#allocation7 + $0x8] sm:$0xff] }
  0x2a   :  { %143 = vmatpush.msra.mxu0 %v100_v27  ;;  %283 = vmatpush.msra.mxu3 %v274_v1  ;;  %v261_v14 = vld [vmem:[#allocation7] sm:$0xff] }
  0x2b   :  { %166 = vmatpush.msra.mxu1 %v116_v28  ;;  %209 = vmatpush.msra.mxu2 %v186_v43  ;;  %v402_v15 = vld [vmem:[%s634_s4] ss:$0 sm:$0xff] }
  0x2c   :  { %144 = vmatpush.msra.mxu0 %v99_v30  ;;  %284 = vmatpush.msra.mxu3 %v273_v2 }
  0x2d   :  { %167 = vmatpush.msra.mxu1 %v115_v31  ;;  %210 = vmatpush.msra.mxu2 %v185_v44 }
  0x2e   :  { %145 = vmatpush.msra.mxu0 %v98_v33  ;;  %285 = vmatpush.msra.mxu3 %v272_v3 }
  0x2f   :  { %168 = vmatpush.msra.mxu1 %v114_v34  ;;  %211 = vmatpush.msra.mxu2 %v184_v45 }
  0x30   :  { %146 = vmatpush.msra.mxu0 %v97_v36  ;;  %286 = vmatpush.msra.mxu3 %v271_v4 }
  0x31   :  { %169 = vmatpush.msra.mxu1 %v113_v37  ;;  %212 = vmatpush.msra.mxu2 %v183_v48 }
  0x32   :  { %147 = vmatpush.msra.mxu0 %v96_v39  ;;  %287 = vmatpush.msra.mxu3 %v270_v5 }
  0x33   :  { %170 = vmatpush.msra.mxu1 %v112_v40  ;;  %148 = vmatmul.f32.vlgmr.msra.gmra.mxu0 %v92_v41 }
  0x34   :  { %171 = vmatmul.f32.vlgmr.msra.gmra.mxu1 %v93_v42  ;;  %213 = vmatpush.msra.mxu2 %v182_v49 }
  0x35   :  { %288 = vmatpush.msra.mxu3 %v269_v6 }
  0x36   :  { %214 = vmatpush.msra.mxu2 %v181_v50 }
  0x37   :  { %289 = vmatpush.msra.mxu3 %v268_v7 }
  0x38   :  { %215 = vmatpush.msra.mxu2 %v180_v51 }
  0x39   :  { %290 = vmatpush.msra.mxu3 %v267_v8 }
  0x3b   :  { %151 = vmatmul.f32.gmra.mxu0 %v94_v46  ;;  %291 = vmatpush.msra.mxu3 %v266_v9  ;;  %v403_v46 = vld [vmem:[%s636_s6] ss:$0 sm:$0xff] }
  0x3c   :  { %174 = vmatmul.f32.gmra.mxu1 %v95_v47 }
  0x3d   :  { %292 = vmatpush.msra.mxu3 %v265_v10 }
  0x3f   :  { %293 = vmatpush.msra.mxu3 %v264_v11 }
  0x41   :  { %294 = vmatpush.msra.mxu3 %v263_v12 }
  0x43   :  { %295 = vmatpush.msra.mxu3 %v262_v13 }
  0x45   :  { %296 = vmatpush.msra.mxu3 %v261_v14 }
  0xb0   :  { %v149_v53 = vpop.f32.mrf.mxu0 }
  0xb1   :  { %v172_v54 = vpop.f32.mrf.mxu1  ;;  %v150_v55 = vadd.f32 %v401_v52, %v149_v53 }
  0xb3   :  { %v173_v56 = vadd.f32 %v172_v54, %v150_v55 }
  0xb5   :  { %v178_v57 = vmax.f32 %v173_v56, 0.0 }
  0xb7   :  { %216 = vmatmul.f32.vlgmr.msra.gmra.mxu2 %v178_v57 }
  0xb8   :  { %v152_v58 = vpop.f32.mrf.mxu0 }
  0xb9   :  { %v175_v59 = vpop.f32.mrf.mxu1  ;;  %v153_v60 = vadd.f32 %v401_v52, %v152_v58 }
  0xbb   :  { %v176_v61 = vadd.f32 %v175_v59, %v153_v60 }
  0xbd   :  { %v179_v62 = vmax.f32 %v176_v61, 0.0 }
  0xbf   :  { %219 = vmatmul.f32.gmra.mxu2 %v179_v62 }
 0x13a   :  { %v217_v16 = vpop.f32.mrf.mxu2 }
 0x13b   :  { %v218_v17 = vadd.f32 %v402_v15, %v217_v16 }
 0x13d   :  { %v391_v18 = vmul.f32 -1.442695, %v218_v17 }
 0x13f   :  { %404 = vpow2.f32 %v391_v18 }
 0x142   :  { %v220_v19 = vpop.f32.mrf.mxu2 }
 0x143   :  { %v221_v20 = vadd.f32 %v402_v15, %v220_v19 }
 0x145   :  { %v405_v21 = vpop.eup %404  ;;  %v392_v22 = vmul.f32 -1.442695, %v221_v20 }
 0x146   :  { %v229_v23 = vadd.f32 1.0, %v405_v21 }
 0x147   :  { %406 = vpow2.f32 %v392_v22 }
 0x148   :  { %408 = vrcp.f32 %v229_v23  ;;  %v242_v29 = vand.u32 2147483648, %v229_v23  ;;  %v240_v31 = vand.u32 2147483647, %v229_v23  ;;  %vm236_vm1 = vweird.f32 %v229_v23 }
 0x14a   :  { %v243_v34 = vor.u32 1.1754944e-38, %v242_v29  ;;  %vm241_vm3 = vcmp.eq.f32.partialorder %v240_v31, 8.507059e+37 }
 0x14d   :  { %v407_v24 = vpop.eup %406 }
 0x14e   :  { %v409_v25 = vpop.eup %408  ;;  %v230_v26 = vadd.f32 1.0, %v407_v24 }
 0x14f   :  { %v232_v27 = vmul.f32 %v409_v25, %v229_v23  ;;  %vm237_vm0 = vweird.f32 %v409_v25 }
 0x150   :  { %410 = vrcp.f32 %v230_v26  ;;  %vm238_vm2 = vmor %vm236_vm1, %vm237_vm0  ;;  %v257_v39 = vand.u32 2147483648, %v230_v26  ;;  %v255_v41 = vand.u32 2147483647, %v230_v26  ;;  %vm251_vm5 = vweird.f32 %v230_v26 }
 0x151   :  { %v233_v28 = vsub.f32 1.0, %v232_v27  ;;  %vm372_vm0 = vcmask 1041409  }
 0x152   :  { %v258_v43 = vor.u32 1.1754944e-38, %v257_v39  ;;  %vm256_vm7 = vcmp.eq.f32.partialorder %v255_v41, 8.507059e+37 }
 0x153   :  { %v234_v30 = vmul.f32 %v409_v25, %v233_v28 }
 0x155   :  { %v235_v32 = vadd.f32 %v409_v25, %v234_v30 }
 0x156   :  { %v411_v33 = vpop.eup %410 }
 0x157   :  { %v239_v35 = vsel %vm238_vm2, %v409_v25, %v235_v32  ;;  %v247_v36 = vmul.f32 %v411_v33, %v230_v26  ;;  %vm252_vm4 = vweird.f32 %v411_v33 }
 0x158   :  { %v602_v37 = vsel %vm241_vm3, %v243_v34, %v239_v35  ;;  %vm253_vm6 = vmor %vm251_vm5, %vm252_vm4 }
 0x159   :  { %297 = vmatmul.f32.vlgmr.msra.gmra.mxu3 %v602_v37  ;;  %352 = vst [vmem:[%s637_s7] sm:$0xff] %v602_v37  ;;  %v248_v38 = vsub.f32 1.0, %v247_v36 }
 0x15b   :  { %v249_v40 = vmul.f32 %v411_v33, %v248_v38 }
 0x15d   :  { %v250_v42 = vadd.f32 %v411_v33, %v249_v40 }
 0x15f   :  { %v254_v44 = vsel %vm253_vm6, %v411_v33, %v250_v42 }
 0x160   :  { %v609_v45 = vsel %vm256_vm7, %v258_v43, %v254_v44 }
 0x161   :  { %300 = vmatmul.f32.gmra.mxu3 %v609_v45  ;;  %353 = vst [vmem:[%s637_s7 + $0x8] sm:$0xff] %v609_v45 }
 0x1dc   :  { %v298_v47 = vpop.f32.mrf.mxu3 }
 0x1dd   :  { %v299_v48 = vadd.f32 %v403_v46, %v298_v47 }
 0x1df   :  { %412 = vtanh.f32 %v299_v48 }
 0x1e4   :  { %v301_v49 = vpop.f32.mrf.mxu3 }
 0x1e5   :  { %v413_v50 = vpop.eup %412  ;;  %v302_v51 = vadd.f32 %v403_v46, %v301_v49 }
 0x1e6   :  { %v306_v52 = vmul.f32 1.442695, %v413_v50 }
 0x1e7   :  { %414 = vtanh.f32 %v302_v51 }
 0x1e8   :  { %416 = vpow2.f32 %v306_v52 }
 0x1ed   :  { %v415_v53 = vpop.eup %414 }
 0x1ee   :  { %v417_v54 = vpop.eup %416  ;;  %v308_v55 = vmul.f32 1.442695, %v415_v53 }
 0x1ef   :  { %v310_v56 = vrot.slane %v417_v54, 4 }
 0x1f0   :  { %418 = vpow2.f32 %v308_v55 }
 0x1f1   :  { %v311_v57 = vadd.f32 %v417_v54, %v310_v56 }
 0x1f3   :  { %v312_v58 = vrot.slane %v311_v57, 2 }
 0x1f5   :  { %v313_v59 = vadd.f32 %v312_v58, %v311_v57 }
 0x1f6   :  { %v419_v60 = vpop.eup %418 }
 0x1f7   :  { %v314_v61 = vrot.slane %v313_v59, 1  ;;  %v316_v62 = vrot.slane %v419_v60, 4 }
 0x1f9   :  { %v315_v63 = vadd.f32 %v314_v61, %v313_v59  ;;  %v317_v0 = vadd.f32 %v419_v60, %v316_v62 }
 0x1fb   :  { %420 = vrcp.f32 %v315_v63  ;;  %v318_v1 = vrot.slane %v317_v0, 2  ;;  %v333_v8 = vand.u32 2147483648, %v315_v63  ;;  %v331_v10 = vand.u32 2147483647, %v315_v63 }
 0x1fc   :  { %vm327_vm9 = vweird.f32 %v315_v63 }
 0x1fd   :  { %v319_v2 = vadd.f32 %v318_v1, %v317_v0  ;;  %v334_v12 = vor.u32 1.1754944e-38, %v333_v8  ;;  %vm332_vm11 = vcmp.eq.f32.partialorder %v331_v10, 8.507059e+37 }
 0x1ff   :  { %v320_v3 = vrot.slane %v319_v2, 1 }
 0x201   :  { %v421_v4 = vpop.eup %420  ;;  %v321_v6 = vadd.f32 %v320_v3, %v319_v2 }
 0x202   :  { %v323_v5 = vmul.f32 %v421_v4, %v315_v63  ;;  %vm328_vm8 = vweird.f32 %v421_v4 }
 0x203   :  { %422 = vrcp.f32 %v321_v6  ;;  %vm329_vm10 = vmor %vm327_vm9, %vm328_vm8  ;;  %v348_v20 = vand.u32 2147483648, %v321_v6  ;;  %v346_v22 = vand.u32 2147483647, %v321_v6  ;;  %vm342_vm13 = vweird.f32 %v321_v6 }
 0x204   :  { %v324_v7 = vsub.f32 1.0, %v323_v5 }
 0x205   :  { %v349_v25 = vor.u32 1.1754944e-38, %v348_v20  ;;  %vm347_vm15 = vcmp.eq.f32.partialorder %v346_v22, 8.507059e+37 }
 0x206   :  { %v325_v9 = vmul.f32 %v421_v4, %v324_v7 }
 0x208   :  { %v326_v11 = vadd.f32 %v421_v4, %v325_v9 }
 0x209   :  { %v423_v13 = vpop.eup %422 }
 0x20a   :  { %v330_v14 = vsel %vm329_vm10, %v421_v4, %v326_v11  ;;  %v338_v16 = vmul.f32 %v423_v13, %v321_v6  ;;  %vm343_vm12 = vweird.f32 %v423_v13 }
 0x20b   :  { %v335_v15 = vsel %vm332_vm11, %v334_v12, %v330_v14  ;;  %vm344_vm14 = vmor %vm342_vm13, %vm343_vm12 }
 0x20c   :  { %v336_v17 = vmul.f32 %v417_v54, %v335_v15  ;;  %v339_v18 = vsub.f32 1.0, %v338_v16 }
 0x20e   :  { %354 = vst [vmem:[%s639_s9] sm:$0xff] %v336_v17  ;;  %v356_v19 = vmul.f32 %v336_v17, %v602_v37  ;;  %v340_v21 = vmul.f32 %v423_v13, %v339_v18 }
 0x210   :  { %v358_v23 = vrot.slane %v356_v19, 4  ;;  %v341_v24 = vadd.f32 %v423_v13, %v340_v21 }
 0x212   :  { %v359_v26 = vadd.f32 %v358_v23, %v356_v19  ;;  %v345_v27 = vsel %vm344_vm14, %v423_v13, %v341_v24 }
 0x213   :  { %v350_v28 = vsel %vm347_vm15, %v349_v25, %v345_v27 }
 0x214   :  { %v351_v29 = vmul.f32 %v419_v60, %v350_v28  ;;  %v360_v30 = vrot.slane %v359_v26, 2 }
 0x216   :  { %355 = vst [vmem:[%s639_s9 + $0x8] sm:$0xff] %v351_v29  ;;  %v357_v31 = vmul.f32 %v351_v29, %v609_v45  ;;  %v361_v33 = vadd.f32 %v360_v30, %v359_v26 }
 0x218   :  { %v364_v32 = vrot.slane %v357_v31, 4  ;;  %v362_v36 = vrot.slane %v361_v33, 1 }
 0x21a   :  { %v365_v34 = vadd.f32 %v364_v32, %v357_v31  ;;  %v363_v39 = vadd.f32 %v362_v36, %v361_v33 }
 0x21c   :  { %v366_v35 = vrot.slane %v365_v34, 2 }
 0x21e   :  { %v367_v37 = vadd.f32 %v366_v35, %v365_v34 }
 0x220   :  { %v368_v38 = vrot.slane %v367_v37, 1 }
 0x222   :  { %v369_v40 = vadd.f32 %v368_v38, %v367_v37 }
 0x224   :  { %v373_v41 = vsel %vm372_vm0, %v369_v40, %v363_v39 }
 0x225   :  { %375 = vst [vmem:[%s638_s8] sm:$0x3] %v373_v41 }
 0x226   :  { %388 = vsyncpa [#allocation3], 1 }
 0x227   :  { %389 = vsyncpa [#allocation5], 1 }
 0x228   :  { %390 = vsyncpa [#allocation8], 1 }

</bundles_post_ra>
